<compile_context>
chip_gen: v7x
topology: tpu7x:2x2x1
jax: 0.10.0
libtpu: 0.0.40
codegen_flags: <defaults>
</compile_context>

<pallas_src>
import math
import jax
import jax.numpy as jnp
from jax.experimental import pallas as pl
from jax.experimental.pallas import tpu as pltpu

# ---------------- model config (matches the nn.Module defaults) ----------------
INPUT_DIM = 32
D_MODEL = 64
NHEAD = 4            # numerically irrelevant: seq_len == 1 => attention weights == 1
NUM_LAYERS = 2
DIM_FF = 128
OUTPUT_DIM = 8
LN_EPS = 1e-5        # PyTorch TransformerEncoderLayer layer_norm_eps default

DPAD = 128           # lane-dense working width (everything padded to 128 lanes)
BATCH = 16

# packed-slab indexing
W_OUT_IDX = 1 + 3 * NUM_LAYERS          # 7
B_OUT_IDX = 1 + 7 * NUM_LAYERS          # 15
NUM_W = W_OUT_IDX + 1                   # 8
NUM_B = B_OUT_IDX + 1                   # 16


# =============================== kernel ======================================
def transformer_block_kernel(x_ref, w_ref, b_ref, o_ref):
    # x_ref: (TB, 128)  -- input padded with zeros beyond INPUT_DIM
    # w_ref: (8, 128, 128) packed, pre-transposed (K, N) weights, zero-padded
    # b_ref: (16, 1, 128) packed biases / LN params, zero-padded
    # o_ref: (TB, 128)  -- lane-dense output; softmax lives in the first OUTPUT_DIM lanes

    # lane mask over the real D_MODEL lanes (hoisted, built once)
    lane_mask = (jax.lax.broadcasted_iota(jnp.int32, (1, DPAD), 1) < D_MODEL).astype(jnp.float32)
    inv_d = 1.0 / D_MODEL

    def ln(h, w, b):
        # padded lanes of h are exactly zero, so the plain sum is the masked sum
        mu = jnp.sum(h, axis=-1, keepdims=True) * inv_d
        d = (h - mu) * lane_mask
        var = jnp.sum(d * d, axis=-1, keepdims=True) * inv_d
        return d * jax.lax.rsqrt(var + LN_EPS) * w + b   # padded lanes stay 0 (w, b pads are 0)

    # input projection + positional encoding (pe folded into the bias)
    h = jnp.dot(x_ref[...], w_ref[0], preferred_element_type=jnp.float32) + b_ref[0]

    # encoder layers (post-norm, relu, dropout = identity in eval mode)
    for l in range(NUM_LAYERS):
        wbase = 1 + 3 * l
        bbase = 1 + 7 * l

        # fused self-attention (seq_len == 1): attn == h @ (wv.T @ wo.T) + (bv @ wo.T + bo)
        attn = jnp.dot(h, w_ref[wbase + 0], preferred_element_type=jnp.float32) + b_ref[bbase + 0]
        h = ln(h + attn, b_ref[bbase + 3], b_ref[bbase + 4])

        ff = jnp.dot(h, w_ref[wbase + 1], preferred_element_type=jnp.float32) + b_ref[bbase + 1]
        ff = jnp.maximum(ff, 0.0)
        ff = jnp.dot(ff, w_ref[wbase + 2], preferred_element_type=jnp.float32) + b_ref[bbase + 2]
        h = ln(h + ff, b_ref[bbase + 5], b_ref[bbase + 6])

    # output projection; padded output lanes get bias -1e30 so softmax over 128 lanes is exact
    out = jnp.dot(h, w_ref[W_OUT_IDX], preferred_element_type=jnp.float32) + b_ref[B_OUT_IDX]
    m = jnp.max(out, axis=-1, keepdims=True)
    e = jnp.exp(out - m)
    o_ref[...] = e / jnp.sum(e, axis=-1, keepdims=True)   # exact divide (per review)
    # TODO(synk): 'top_k' output_activation (torch.topk + scatter) not implemented in-kernel.


# =============================== wrapper =====================================
def pack_params(params):
    """One-time host/XLA-side preprocessing: transpose, fuse, pad, pack into two slabs."""
    (w_in, b_in, pe0, wv, bv, wo, bo, w1, b1, w2, b2,
     ln1w, ln1b, ln2w, ln2b, w_out, b_out) = params

    def padw(wT):                       # (K, N) -> (DPAD, DPAD), zero-padded
        K, N = wT.shape
        return jnp.zeros((DPAD, DPAD), jnp.float32).at[:K, :N].set(wT)

    def padb(b):                        # (1, N) -> (1, DPAD), zero-padded
        return jnp.zeros((1, DPAD), jnp.float32).at[:, :b.shape[-1]].set(b)

    w_list = [padw(w_in.T)]
    b_list = [padb(b_in + pe0)]         # pe at position 0 folded into the input bias
    for l in range(NUM_LAYERS):
        w_attn_T = wv[l].T @ wo[l].T                    # fused V-proj + out-proj
        b_attn = bv[l] @ wo[l].T + bo[l]
        w_list += [padw(w_attn_T), padw(w1[l].T), padw(w2[l].T)]
        b_list += [padb(b_attn), padb(b1[l]), padb(b2[l]),
                   padb(ln1w[l]), padb(ln1b[l]), padb(ln2w[l]), padb(ln2b[l])]
    w_list.append(padw(w_out.T))
    b_list.append(jnp.full((1, DPAD), -1e30, jnp.float32).at[:, :OUTPUT_DIM].set(b_out))

    w_slab = jnp.stack(w_list)          # (8, 128, 128)
    b_slab = jnp.stack(b_list)          # (16, 1, 128)
    return w_slab, b_slab


@jax.jit
def transformer_block(x, w_slab, b_slab):
    B = x.shape[0]
    TB = B                              # whole batch in a single grid step (review item)
    x_pad = jnp.zeros((B, DPAD), jnp.float32).at[:, :INPUT_DIM].set(x)

    y = pl.pallas_call(
        transformer_block_kernel,
        out_shape=jax.ShapeDtypeStruct((B, DPAD), jnp.float32),
        grid_spec=pltpu.PrefetchScalarGridSpec(
            num_scalar_prefetch=0,
            grid=(B // TB,),
            in_specs=[
                pl.BlockSpec((TB, DPAD), lambda i: (i, 0)),
                pl.BlockSpec((NUM_W, DPAD, DPAD), lambda i: (0, 0, 0)),
                pl.BlockSpec((NUM_B, 1, DPAD), lambda i: (0, 0, 0)),
            ],
            out_specs=pl.BlockSpec((TB, DPAD), lambda i: (i, 0)),
        ),
        compiler_params=pltpu.CompilerParams(
            dimension_semantics=("arbitrary",)),
    )(x_pad, w_slab, b_slab)
    return y[:, :OUTPUT_DIM]            # drop the lane padding


# =============================== reference & test ============================
def init_params(key):
    """Deterministic synthetic weights with the same shapes as the PyTorch module."""
    ks = jax.random.split(key, 32)
    k = iter(ks)

    def rnd(shape, scale):
        return jax.random.normal(next(k), shape, jnp.float32) * scale

    w_in = rnd((D_MODEL, INPUT_DIM), 1.0 / math.sqrt(INPUT_DIM))
    b_in = rnd((1, D_MODEL), 0.02)
    # positional encoding at position 0: sin(0)=0 (even dims), cos(0)=1 (odd dims)
    pe0 = jnp.zeros((D_MODEL,), jnp.float32).at[1::2].set(1.0).reshape(1, D_MODEL)

    wv = rnd((NUM_LAYERS, D_MODEL, D_MODEL), 1.0 / math.sqrt(D_MODEL))
    bv = rnd((NUM_LAYERS, 1, D_MODEL), 0.02)
    wo = rnd((NUM_LAYERS, D_MODEL, D_MODEL), 1.0 / math.sqrt(D_MODEL))
    bo = rnd((NUM_LAYERS, 1, D_MODEL), 0.02)
    w1 = rnd((NUM_LAYERS, DIM_FF, D_MODEL), 1.0 / math.sqrt(D_MODEL))
    b1 = rnd((NUM_LAYERS, 1, DIM_FF), 0.02)
    w2 = rnd((NUM_LAYERS, D_MODEL, DIM_FF), 1.0 / math.sqrt(DIM_FF))
    b2 = rnd((NUM_LAYERS, 1, D_MODEL), 0.02)
    ln1w = jnp.ones((NUM_LAYERS, 1, D_MODEL), jnp.float32)
    ln1b = jnp.zeros((NUM_LAYERS, 1, D_MODEL), jnp.float32)
    ln2w = jnp.ones((NUM_LAYERS, 1, D_MODEL), jnp.float32)
    ln2b = jnp.zeros((NUM_LAYERS, 1, D_MODEL), jnp.float32)
    w_out = rnd((OUTPUT_DIM, D_MODEL), 1.0 / math.sqrt(D_MODEL))
    b_out = rnd((1, OUTPUT_DIM), 0.02)

    return (w_in, b_in, pe0, wv, bv, wo, bo, w1, b1, w2, b2,
            ln1w, ln1b, ln2w, ln2b, w_out, b_out)


def reference_forward(x, params):
    """Pure-JAX reference mirroring the PyTorch forward (eval mode, seq_len=1, UNfused)."""
    (w_in, b_in, pe0, wv, bv, wo, bo, w1, b1, w2, b2,
     ln1w, ln1b, ln2w, ln2b, w_out, b_out) = params

    def ln(h, w, b):
        mu = jnp.mean(h, axis=-1, keepdims=True)
        var = jnp.mean((h - mu) ** 2, axis=-1, keepdims=True)
        return (h - mu) * jax.lax.rsqrt(var + LN_EPS) * w + b

    h = x @ w_in.T + b_in + pe0
    for l in range(NUM_LAYERS):
        v = h @ wv[l].T + bv[l]
        attn = v @ wo[l].T + bo[l]
        h = ln(h + attn, ln1w[l], ln1b[l])
        ff = jnp.maximum(h @ w1[l].T + b1[l], 0.0) @ w2[l].T + b2[l]
        h = ln(h + ff, ln2w[l], ln2b[l])
    out = h @ w_out.T + b_out
    return jax.nn.softmax(out, axis=-1)


if __name__ == "__main__":
    key = jax.random.PRNGKey(0)
    kx, kp = jax.random.split(key)
    x = jax.random.normal(kx, (BATCH, INPUT_DIM), jnp.float32)
    params = init_params(kp)
    w_slab, b_slab = pack_params(params)

    y = transformer_block(x, w_slab, b_slab)
    y = jax.block_until_ready(y)

    y_ref = reference_forward(x, params)
    assert y.shape == (BATCH, OUTPUT_DIM)
    err = float(jnp.max(jnp.abs(y - y_ref)))
    assert jnp.allclose(y, y_ref, atol=2e-5, rtol=2e-5), err
    print("KERNEL_OK")
</pallas_src>

<mosaic_0001>
module attributes {stable_mosaic.version = 11 : i64} {
  func.func @transformer_block_kernel(%arg0: i32, %arg1: memref<16x128xf32, #tpu.memory_space<vmem>>, %arg2: memref<8x128x128xf32, #tpu.memory_space<vmem>>, %arg3: memref<16x1x128xf32, #tpu.memory_space<vmem>>, %arg4: memref<16x128xf32, #tpu.memory_space<vmem>>) attributes {dimension_semantics = [#tpu.dimension_semantics<arbitrary>], iteration_bounds = array<i64: 1>, scalar_prefetch = 0 : i64, scratch_operands = 0 : i64, tpu.core_type = #tpu.core_type<tc>, window_params = [{transform_indices = @transform_0, window_bounds = array<i64: 16, 128>}, {pipeline_mode = #tpu.pipeline_mode<synchronous>, transform_indices = @transform_1, window_bounds = array<i64: 8, 128, 128>}, {pipeline_mode = #tpu.pipeline_mode<synchronous>, transform_indices = @transform_2, window_bounds = array<i64: 16, 1, 128>}, {transform_indices = @transform_3, window_bounds = array<i64: 16, 128>}]} {
    %0 = tpu.iota {dimensions = array<i32: 1>} : vector<1x128xi32>
    %c64_i32 = arith.constant 64 : i32
    %1 = vector.broadcast %c64_i32 : i32 to vector<1x128xi32>
    %2 = arith.cmpi slt, %0, %1 : vector<1x128xi32>
    %3 = arith.extui %2 : vector<1x128xi1> to vector<1x128xi32>
    %4 = arith.sitofp %3 : vector<1x128xi32> to vector<1x128xf32>
    %c0 = arith.constant 0 : index
    %c0_0 = arith.constant 0 : index
    %5 = vector.load %arg1[%c0, %c0_0] : memref<16x128xf32, #tpu.memory_space<vmem>>, vector<16x128xf32>
    %c0_1 = arith.constant 0 : index
    %c0_2 = arith.constant 0 : index
    %c0_3 = arith.constant 0 : index
    %6 = vector.load %arg2[%c0_1, %c0_2, %c0_3] : memref<8x128x128xf32, #tpu.memory_space<vmem>>, vector<1x128x128xf32>
    %7 = vector.shape_cast %6 : vector<1x128x128xf32> to vector<128x128xf32>
    %cst = arith.constant dense<0.000000e+00> : vector<16x128xf32>
    %8 = tpu.matmul %5, %7, %cst {dimension_numbers = #tpu.dot_dimension_numbers<[1], [0], [0], [1], [0, 0, 1, 1], [], []>} : vector<16x128xf32>, vector<128x128xf32>, vector<16x128xf32> -> vector<16x128xf32>
    %c0_4 = arith.constant 0 : index
    %c0_5 = arith.constant 0 : index
    %c0_6 = arith.constant 0 : index
    %9 = vector.load %arg3[%c0_4, %c0_5, %c0_6] : memref<16x1x128xf32, #tpu.memory_space<vmem>>, vector<1x1x128xf32>
    %10 = vector.shape_cast %9 : vector<1x1x128xf32> to vector<1x128xf32>
    %11 = vector.broadcast %10 : vector<1x128xf32> to vector<16x128xf32>
    %12 = arith.addf %8, %11 : vector<16x128xf32>
    %c1 = arith.constant 1 : index
    %c0_7 = arith.constant 0 : index
    %c0_8 = arith.constant 0 : index
    %13 = vector.load %arg2[%c1, %c0_7, %c0_8] : memref<8x128x128xf32, #tpu.memory_space<vmem>>, vector<1x128x128xf32>
    %14 = vector.shape_cast %13 : vector<1x128x128xf32> to vector<128x128xf32>
    %cst_9 = arith.constant dense<0.000000e+00> : vector<16x128xf32>
    %15 = tpu.matmul %12, %14, %cst_9 {dimension_numbers = #tpu.dot_dimension_numbers<[1], [0], [0], [1], [0, 0, 1, 1], [], []>} : vector<16x128xf32>, vector<128x128xf32>, vector<16x128xf32> -> vector<16x128xf32>
    %c1_10 = arith.constant 1 : index
    %c0_11 = arith.constant 0 : index
    %c0_12 = arith.constant 0 : index
    %16 = vector.load %arg3[%c1_10, %c0_11, %c0_12] : memref<16x1x128xf32, #tpu.memory_space<vmem>>, vector<1x1x128xf32>
    %17 = vector.shape_cast %16 : vector<1x1x128xf32> to vector<1x128xf32>
    %18 = vector.broadcast %17 : vector<1x128xf32> to vector<16x128xf32>
    %19 = arith.addf %15, %18 : vector<16x128xf32>
    %20 = arith.addf %12, %19 : vector<16x128xf32>
    %c4 = arith.constant 4 : index
    %c0_13 = arith.constant 0 : index
    %c0_14 = arith.constant 0 : index
    %21 = vector.load %arg3[%c4, %c0_13, %c0_14] : memref<16x1x128xf32, #tpu.memory_space<vmem>>, vector<1x1x128xf32>
    %22 = vector.shape_cast %21 : vector<1x1x128xf32> to vector<1x128xf32>
    %c5 = arith.constant 5 : index
    %c0_15 = arith.constant 0 : index
    %c0_16 = arith.constant 0 : index
    %23 = vector.load %arg3[%c5, %c0_15, %c0_16] : memref<16x1x128xf32, #tpu.memory_space<vmem>>, vector<1x1x128xf32>
    %24 = vector.shape_cast %23 : vector<1x1x128xf32> to vector<1x128xf32>
    %cst_17 = arith.constant dense<0.000000e+00> : vector<16xf32>
    %25 = vector.multi_reduction <add>, %20, %cst_17 [1] : vector<16x128xf32> to vector<16xf32>
    %26 = vector.shape_cast %25 : vector<16xf32> to vector<16x1xf32>
    %cst_18 = arith.constant 1.562500e-02 : f32
    %27 = vector.broadcast %cst_18 : f32 to vector<16x1xf32>
    %28 = arith.mulf %26, %27 : vector<16x1xf32>
    %29 = vector.broadcast %28 : vector<16x1xf32> to vector<16x128xf32>
    %30 = arith.subf %20, %29 : vector<16x128xf32>
    %31 = vector.broadcast %4 : vector<1x128xf32> to vector<16x128xf32>
    %32 = arith.mulf %30, %31 : vector<16x128xf32>
    %33 = arith.mulf %32, %32 : vector<16x128xf32>
    %cst_19 = arith.constant dense<0.000000e+00> : vector<16xf32>
    %34 = vector.multi_reduction <add>, %33, %cst_19 [1] : vector<16x128xf32> to vector<16xf32>
    %35 = vector.shape_cast %34 : vector<16xf32> to vector<16x1xf32>
    %cst_20 = arith.constant 1.562500e-02 : f32
    %36 = vector.broadcast %cst_20 : f32 to vector<16x1xf32>
    %37 = arith.mulf %35, %36 : vector<16x1xf32>
    %cst_21 = arith.constant 9.99999974E-6 : f32
    %38 = vector.broadcast %cst_21 : f32 to vector<16x1xf32>
    %39 = arith.addf %37, %38 : vector<16x1xf32>
    %40 = math.rsqrt %39 : vector<16x1xf32>
    %41 = vector.broadcast %40 : vector<16x1xf32> to vector<16x128xf32>
    %42 = arith.mulf %32, %41 : vector<16x128xf32>
    %43 = vector.broadcast %22 : vector<1x128xf32> to vector<16x128xf32>
    %44 = arith.mulf %42, %43 : vector<16x128xf32>
    %45 = vector.broadcast %24 : vector<1x128xf32> to vector<16x128xf32>
    %46 = arith.addf %44, %45 : vector<16x128xf32>
    %c2 = arith.constant 2 : index
    %c0_22 = arith.constant 0 : index
    %c0_23 = arith.constant 0 : index
    %47 = vector.load %arg2[%c2, %c0_22, %c0_23] : memref<8x128x128xf32, #tpu.memory_space<vmem>>, vector<1x128x128xf32>
    %48 = vector.shape_cast %47 : vector<1x128x128xf32> to vector<128x128xf32>
    %cst_24 = arith.constant dense<0.000000e+00> : vector<16x128xf32>
    %49 = tpu.matmul %46, %48, %cst_24 {dimension_numbers = #tpu.dot_dimension_numbers<[1], [0], [0], [1], [0, 0, 1, 1], [], []>} : vector<16x128xf32>, vector<128x128xf32>, vector<16x128xf32> -> vector<16x128xf32>
    %c2_25 = arith.constant 2 : index
    %c0_26 = arith.constant 0 : index
    %c0_27 = arith.constant 0 : index
    %50 = vector.load %arg3[%c2_25, %c0_26, %c0_27] : memref<16x1x128xf32, #tpu.memory_space<vmem>>, vector<1x1x128xf32>
    %51 = vector.shape_cast %50 : vector<1x1x128xf32> to vector<1x128xf32>
    %52 = vector.broadcast %51 : vector<1x128xf32> to vector<16x128xf32>
    %53 = arith.addf %49, %52 : vector<16x128xf32>
    %cst_28 = arith.constant 0.000000e+00 : f32
    %54 = vector.broadcast %cst_28 : f32 to vector<16x128xf32>
    %55 = arith.maximumf %53, %54 : vector<16x128xf32>
    %c3 = arith.constant 3 : index
    %c0_29 = arith.constant 0 : index
    %c0_30 = arith.constant 0 : index
    %56 = vector.load %arg2[%c3, %c0_29, %c0_30] : memref<8x128x128xf32, #tpu.memory_space<vmem>>, vector<1x128x128xf32>
    %57 = vector.shape_cast %56 : vector<1x128x128xf32> to vector<128x128xf32>
    %cst_31 = arith.constant dense<0.000000e+00> : vector<16x128xf32>
    %58 = tpu.matmul %55, %57, %cst_31 {dimension_numbers = #tpu.dot_dimension_numbers<[1], [0], [0], [1], [0, 0, 1, 1], [], []>} : vector<16x128xf32>, vector<128x128xf32>, vector<16x128xf32> -> vector<16x128xf32>
    %c3_32 = arith.constant 3 : index
    %c0_33 = arith.constant 0 : index
    %c0_34 = arith.constant 0 : index
    %59 = vector.load %arg3[%c3_32, %c0_33, %c0_34] : memref<16x1x128xf32, #tpu.memory_space<vmem>>, vector<1x1x128xf32>
    %60 = vector.shape_cast %59 : vector<1x1x128xf32> to vector<1x128xf32>
    %61 = vector.broadcast %60 : vector<1x128xf32> to vector<16x128xf32>
    %62 = arith.addf %58, %61 : vector<16x128xf32>
    %63 = arith.addf %46, %62 : vector<16x128xf32>
    %c6 = arith.constant 6 : index
    %c0_35 = arith.constant 0 : index
    %c0_36 = arith.constant 0 : index
    %64 = vector.load %arg3[%c6, %c0_35, %c0_36] : memref<16x1x128xf32, #tpu.memory_space<vmem>>, vector<1x1x128xf32>
    %65 = vector.shape_cast %64 : vector<1x1x128xf32> to vector<1x128xf32>
    %c7 = arith.constant 7 : index
    %c0_37 = arith.constant 0 : index
    %c0_38 = arith.constant 0 : index
    %66 = vector.load %arg3[%c7, %c0_37, %c0_38] : memref<16x1x128xf32, #tpu.memory_space<vmem>>, vector<1x1x128xf32>
    %67 = vector.shape_cast %66 : vector<1x1x128xf32> to vector<1x128xf32>
    %cst_39 = arith.constant dense<0.000000e+00> : vector<16xf32>
    %68 = vector.multi_reduction <add>, %63, %cst_39 [1] : vector<16x128xf32> to vector<16xf32>
    %69 = vector.shape_cast %68 : vector<16xf32> to vector<16x1xf32>
    %cst_40 = arith.constant 1.562500e-02 : f32
    %70 = vector.broadcast %cst_40 : f32 to vector<16x1xf32>
    %71 = arith.mulf %69, %70 : vector<16x1xf32>
    %72 = vector.broadcast %71 : vector<16x1xf32> to vector<16x128xf32>
    %73 = arith.subf %63, %72 : vector<16x128xf32>
    %74 = vector.broadcast %4 : vector<1x128xf32> to vector<16x128xf32>
    %75 = arith.mulf %73, %74 : vector<16x128xf32>
    %76 = arith.mulf %75, %75 : vector<16x128xf32>
    %cst_41 = arith.constant dense<0.000000e+00> : vector<16xf32>
    %77 = vector.multi_reduction <add>, %76, %cst_41 [1] : vector<16x128xf32> to vector<16xf32>
    %78 = vector.shape_cast %77 : vector<16xf32> to vector<16x1xf32>
    %cst_42 = arith.constant 1.562500e-02 : f32
    %79 = vector.broadcast %cst_42 : f32 to vector<16x1xf32>
    %80 = arith.mulf %78, %79 : vector<16x1xf32>
    %cst_43 = arith.constant 9.99999974E-6 : f32
    %81 = vector.broadcast %cst_43 : f32 to vector<16x1xf32>
    %82 = arith.addf %80, %81 : vector<16x1xf32>
    %83 = math.rsqrt %82 : vector<16x1xf32>
    %84 = vector.broadcast %83 : vector<16x1xf32> to vector<16x128xf32>
    %85 = arith.mulf %75, %84 : vector<16x128xf32>
    %86 = vector.broadcast %65 : vector<1x128xf32> to vector<16x128xf32>
    %87 = arith.mulf %85, %86 : vector<16x128xf32>
    %88 = vector.broadcast %67 : vector<1x128xf32> to vector<16x128xf32>
    %89 = arith.addf %87, %88 : vector<16x128xf32>
    %c4_44 = arith.constant 4 : index
    %c0_45 = arith.constant 0 : index
    %c0_46 = arith.constant 0 : index
    %90 = vector.load %arg2[%c4_44, %c0_45, %c0_46] : memref<8x128x128xf32, #tpu.memory_space<vmem>>, vector<1x128x128xf32>
    %91 = vector.shape_cast %90 : vector<1x128x128xf32> to vector<128x128xf32>
    %cst_47 = arith.constant dense<0.000000e+00> : vector<16x128xf32>
    %92 = tpu.matmul %89, %91, %cst_47 {dimension_numbers = #tpu.dot_dimension_numbers<[1], [0], [0], [1], [0, 0, 1, 1], [], []>} : vector<16x128xf32>, vector<128x128xf32>, vector<16x128xf32> -> vector<16x128xf32>
    %c8 = arith.constant 8 : index
    %c0_48 = arith.constant 0 : index
    %c0_49 = arith.constant 0 : index
    %93 = vector.load %arg3[%c8, %c0_48, %c0_49] : memref<16x1x128xf32, #tpu.memory_space<vmem>>, vector<1x1x128xf32>
    %94 = vector.shape_cast %93 : vector<1x1x128xf32> to vector<1x128xf32>
    %95 = vector.broadcast %94 : vector<1x128xf32> to vector<16x128xf32>
    %96 = arith.addf %92, %95 : vector<16x128xf32>
    %97 = arith.addf %89, %96 : vector<16x128xf32>
    %c11 = arith.constant 11 : index
    %c0_50 = arith.constant 0 : index
    %c0_51 = arith.constant 0 : index
    %98 = vector.load %arg3[%c11, %c0_50, %c0_51] : memref<16x1x128xf32, #tpu.memory_space<vmem>>, vector<1x1x128xf32>
    %99 = vector.shape_cast %98 : vector<1x1x128xf32> to vector<1x128xf32>
    %c12 = arith.constant 12 : index
    %c0_52 = arith.constant 0 : index
    %c0_53 = arith.constant 0 : index
    %100 = vector.load %arg3[%c12, %c0_52, %c0_53] : memref<16x1x128xf32, #tpu.memory_space<vmem>>, vector<1x1x128xf32>
    %101 = vector.shape_cast %100 : vector<1x1x128xf32> to vector<1x128xf32>
    %cst_54 = arith.constant dense<0.000000e+00> : vector<16xf32>
    %102 = vector.multi_reduction <add>, %97, %cst_54 [1] : vector<16x128xf32> to vector<16xf32>
    %103 = vector.shape_cast %102 : vector<16xf32> to vector<16x1xf32>
    %cst_55 = arith.constant 1.562500e-02 : f32
    %104 = vector.broadcast %cst_55 : f32 to vector<16x1xf32>
    %105 = arith.mulf %103, %104 : vector<16x1xf32>
    %106 = vector.broadcast %105 : vector<16x1xf32> to vector<16x128xf32>
    %107 = arith.subf %97, %106 : vector<16x128xf32>
    %108 = vector.broadcast %4 : vector<1x128xf32> to vector<16x128xf32>
    %109 = arith.mulf %107, %108 : vector<16x128xf32>
    %110 = arith.mulf %109, %109 : vector<16x128xf32>
    %cst_56 = arith.constant dense<0.000000e+00> : vector<16xf32>
    %111 = vector.multi_reduction <add>, %110, %cst_56 [1] : vector<16x128xf32> to vector<16xf32>
    %112 = vector.shape_cast %111 : vector<16xf32> to vector<16x1xf32>
    %cst_57 = arith.constant 1.562500e-02 : f32
    %113 = vector.broadcast %cst_57 : f32 to vector<16x1xf32>
    %114 = arith.mulf %112, %113 : vector<16x1xf32>
    %cst_58 = arith.constant 9.99999974E-6 : f32
    %115 = vector.broadcast %cst_58 : f32 to vector<16x1xf32>
    %116 = arith.addf %114, %115 : vector<16x1xf32>
    %117 = math.rsqrt %116 : vector<16x1xf32>
    %118 = vector.broadcast %117 : vector<16x1xf32> to vector<16x128xf32>
    %119 = arith.mulf %109, %118 : vector<16x128xf32>
    %120 = vector.broadcast %99 : vector<1x128xf32> to vector<16x128xf32>
    %121 = arith.mulf %119, %120 : vector<16x128xf32>
    %122 = vector.broadcast %101 : vector<1x128xf32> to vector<16x128xf32>
    %123 = arith.addf %121, %122 : vector<16x128xf32>
    %c5_59 = arith.constant 5 : index
    %c0_60 = arith.constant 0 : index
    %c0_61 = arith.constant 0 : index
    %124 = vector.load %arg2[%c5_59, %c0_60, %c0_61] : memref<8x128x128xf32, #tpu.memory_space<vmem>>, vector<1x128x128xf32>
    %125 = vector.shape_cast %124 : vector<1x128x128xf32> to vector<128x128xf32>
    %cst_62 = arith.constant dense<0.000000e+00> : vector<16x128xf32>
    %126 = tpu.matmul %123, %125, %cst_62 {dimension_numbers = #tpu.dot_dimension_numbers<[1], [0], [0], [1], [0, 0, 1, 1], [], []>} : vector<16x128xf32>, vector<128x128xf32>, vector<16x128xf32> -> vector<16x128xf32>
    %c9 = arith.constant 9 : index
    %c0_63 = arith.constant 0 : index
    %c0_64 = arith.constant 0 : index
    %127 = vector.load %arg3[%c9, %c0_63, %c0_64] : memref<16x1x128xf32, #tpu.memory_space<vmem>>, vector<1x1x128xf32>
    %128 = vector.shape_cast %127 : vector<1x1x128xf32> to vector<1x128xf32>
    %129 = vector.broadcast %128 : vector<1x128xf32> to vector<16x128xf32>
    %130 = arith.addf %126, %129 : vector<16x128xf32>
    %cst_65 = arith.constant 0.000000e+00 : f32
    %131 = vector.broadcast %cst_65 : f32 to vector<16x128xf32>
    %132 = arith.maximumf %130, %131 : vector<16x128xf32>
    %c6_66 = arith.constant 6 : index
    %c0_67 = arith.constant 0 : index
    %c0_68 = arith.constant 0 : index
    %133 = vector.load %arg2[%c6_66, %c0_67, %c0_68] : memref<8x128x128xf32, #tpu.memory_space<vmem>>, vector<1x128x128xf32>
    %134 = vector.shape_cast %133 : vector<1x128x128xf32> to vector<128x128xf32>
    %cst_69 = arith.constant dense<0.000000e+00> : vector<16x128xf32>
    %135 = tpu.matmul %132, %134, %cst_69 {dimension_numbers = #tpu.dot_dimension_numbers<[1], [0], [0], [1], [0, 0, 1, 1], [], []>} : vector<16x128xf32>, vector<128x128xf32>, vector<16x128xf32> -> vector<16x128xf32>
    %c10 = arith.constant 10 : index
    %c0_70 = arith.constant 0 : index
    %c0_71 = arith.constant 0 : index
    %136 = vector.load %arg3[%c10, %c0_70, %c0_71] : memref<16x1x128xf32, #tpu.memory_space<vmem>>, vector<1x1x128xf32>
    %137 = vector.shape_cast %136 : vector<1x1x128xf32> to vector<1x128xf32>
    %138 = vector.broadcast %137 : vector<1x128xf32> to vector<16x128xf32>
    %139 = arith.addf %135, %138 : vector<16x128xf32>
    %140 = arith.addf %123, %139 : vector<16x128xf32>
    %c13 = arith.constant 13 : index
    %c0_72 = arith.constant 0 : index
    %c0_73 = arith.constant 0 : index
    %141 = vector.load %arg3[%c13, %c0_72, %c0_73] : memref<16x1x128xf32, #tpu.memory_space<vmem>>, vector<1x1x128xf32>
    %142 = vector.shape_cast %141 : vector<1x1x128xf32> to vector<1x128xf32>
    %c14 = arith.constant 14 : index
    %c0_74 = arith.constant 0 : index
    %c0_75 = arith.constant 0 : index
    %143 = vector.load %arg3[%c14, %c0_74, %c0_75] : memref<16x1x128xf32, #tpu.memory_space<vmem>>, vector<1x1x128xf32>
    %144 = vector.shape_cast %143 : vector<1x1x128xf32> to vector<1x128xf32>
    %cst_76 = arith.constant dense<0.000000e+00> : vector<16xf32>
    %145 = vector.multi_reduction <add>, %140, %cst_76 [1] : vector<16x128xf32> to vector<16xf32>
    %146 = vector.shape_cast %145 : vector<16xf32> to vector<16x1xf32>
    %cst_77 = arith.constant 1.562500e-02 : f32
    %147 = vector.broadcast %cst_77 : f32 to vector<16x1xf32>
    %148 = arith.mulf %146, %147 : vector<16x1xf32>
    %149 = vector.broadcast %148 : vector<16x1xf32> to vector<16x128xf32>
    %150 = arith.subf %140, %149 : vector<16x128xf32>
    %151 = vector.broadcast %4 : vector<1x128xf32> to vector<16x128xf32>
    %152 = arith.mulf %150, %151 : vector<16x128xf32>
    %153 = arith.mulf %152, %152 : vector<16x128xf32>
    %cst_78 = arith.constant dense<0.000000e+00> : vector<16xf32>
    %154 = vector.multi_reduction <add>, %153, %cst_78 [1] : vector<16x128xf32> to vector<16xf32>
    %155 = vector.shape_cast %154 : vector<16xf32> to vector<16x1xf32>
    %cst_79 = arith.constant 1.562500e-02 : f32
    %156 = vector.broadcast %cst_79 : f32 to vector<16x1xf32>
    %157 = arith.mulf %155, %156 : vector<16x1xf32>
    %cst_80 = arith.constant 9.99999974E-6 : f32
    %158 = vector.broadcast %cst_80 : f32 to vector<16x1xf32>
    %159 = arith.addf %157, %158 : vector<16x1xf32>
    %160 = math.rsqrt %159 : vector<16x1xf32>
    %161 = vector.broadcast %160 : vector<16x1xf32> to vector<16x128xf32>
    %162 = arith.mulf %152, %161 : vector<16x128xf32>
    %163 = vector.broadcast %142 : vector<1x128xf32> to vector<16x128xf32>
    %164 = arith.mulf %162, %163 : vector<16x128xf32>
    %165 = vector.broadcast %144 : vector<1x128xf32> to vector<16x128xf32>
    %166 = arith.addf %164, %165 : vector<16x128xf32>
    %c7_81 = arith.constant 7 : index
    %c0_82 = arith.constant 0 : index
    %c0_83 = arith.constant 0 : index
    %167 = vector.load %arg2[%c7_81, %c0_82, %c0_83] : memref<8x128x128xf32, #tpu.memory_space<vmem>>, vector<1x128x128xf32>
    %168 = vector.shape_cast %167 : vector<1x128x128xf32> to vector<128x128xf32>
    %cst_84 = arith.constant dense<0.000000e+00> : vector<16x128xf32>
    %169 = tpu.matmul %166, %168, %cst_84 {dimension_numbers = #tpu.dot_dimension_numbers<[1], [0], [0], [1], [0, 0, 1, 1], [], []>} : vector<16x128xf32>, vector<128x128xf32>, vector<16x128xf32> -> vector<16x128xf32>
    %c15 = arith.constant 15 : index
    %c0_85 = arith.constant 0 : index
    %c0_86 = arith.constant 0 : index
    %170 = vector.load %arg3[%c15, %c0_85, %c0_86] : memref<16x1x128xf32, #tpu.memory_space<vmem>>, vector<1x1x128xf32>
    %171 = vector.shape_cast %170 : vector<1x1x128xf32> to vector<1x128xf32>
    %172 = vector.broadcast %171 : vector<1x128xf32> to vector<16x128xf32>
    %173 = arith.addf %169, %172 : vector<16x128xf32>
    %cst_87 = arith.constant dense<0xFF800000> : vector<16xf32>
    %174 = vector.multi_reduction <maximumf>, %173, %cst_87 [1] : vector<16x128xf32> to vector<16xf32>
    %175 = vector.shape_cast %174 : vector<16xf32> to vector<16x1xf32>
    %176 = vector.broadcast %175 : vector<16x1xf32> to vector<16x128xf32>
    %177 = arith.subf %173, %176 : vector<16x128xf32>
    %178 = math.exp %177 : vector<16x128xf32>
    %cst_88 = arith.constant dense<0.000000e+00> : vector<16xf32>
    %179 = vector.multi_reduction <add>, %178, %cst_88 [1] : vector<16x128xf32> to vector<16xf32>
    %180 = vector.shape_cast %179 : vector<16xf32> to vector<16x1xf32>
    %181 = vector.broadcast %180 : vector<16x1xf32> to vector<16x128xf32>
    %182 = arith.divf %178, %181 : vector<16x128xf32>
    %c0_89 = arith.constant 0 : index
    %c0_90 = arith.constant 0 : index
    %183 = vector.load %arg4[%c0_89, %c0_90] : memref<16x128xf32, #tpu.memory_space<vmem>>, vector<16x128xf32>
    tpu.vector_store %arg4[%c0_89, %c0_90], %182 {strides = array<i32>} : memref<16x128xf32, #tpu.memory_space<vmem>>, vector<16x128xf32>,
    return
  }
  func.func @transform_0(%arg0: i32) -> (i32, i32) {
    %c0_i32 = arith.constant 0 : i32
    %c0_i32_0 = arith.constant 0 : i32
    return %arg0, %c0_i32 : i32, i32
  }
  func.func @transform_1(%arg0: i32) -> (i32, i32, i32) {
    %c0_i32 = arith.constant 0 : i32
    %c0_i32_0 = arith.constant 0 : i32
    %c0_i32_1 = arith.constant 0 : i32
    %c0_i32_2 = arith.constant 0 : i32
    return %c0_i32, %c0_i32_0, %c0_i32_1 : i32, i32, i32
  }
  func.func @transform_2(%arg0: i32) -> (i32, i32, i32) {
    %c0_i32 = arith.constant 0 : i32
    %c0_i32_0 = arith.constant 0 : i32
    %c0_i32_1 = arith.constant 0 : i32
    %c0_i32_2 = arith.constant 0 : i32
    return %c0_i32, %c0_i32_0, %c0_i32_1 : i32, i32, i32
  }
  func.func @transform_3(%arg0: i32) -> (i32, i32) {
    %c0_i32 = arith.constant 0 : i32
    %c0_i32_0 = arith.constant 0 : i32
    return %arg0, %c0_i32 : i32, i32
  }
}

</mosaic_0001>

<bundles_post_ra>
// kernel: transformer_block.1
= control target key start
LH: loop header
LB: loop body
LE: loop exit
PB: predicated region body
PF: predicated region fallthrough
CT: control target
= control target key end

     0   :  { %8 = vsyncpa [#allocation3], 0  ;;  %s1810_s12 = smov [#allocation2]   ;;  %s1936_s0 = inlined_call_operand.vmem [shape: f32[16,128], index: 0, kind: input, shape index: {}]   ;;  %s1937_s1 = inlined_call_operand.hbm [shape: f32[8,128,128], index: 1, kind: input, shape index: {}]   ;;  %s1938_s2 = inlined_call_operand.vmem [shape: f32[16,1,128], index: 2, kind: input, shape index: {}]   ;;  %s1939_s3 = inlined_call_operand.vmem [shape: f32[16,128], index: 3, kind: output, shape index: {}]  }
   0x1   :  { %s16_s13 = sshll.u32 %s1810_s12, 4  ;;  %s1786_s16 = scalar_lea.hbm %s1937_s1, 16384  ;;  %s17_s13 = int_to_ptr.vmem [resolvable:$true] %s16_s13 }
   0x2   :  { %p1787_p0 = scmp.ne.s32.totalorder %s1937_s1, %s1786_s16  ;;  %p1790_p1 = scmp.lt.u32.totalorder %s1786_s16, %s1937_s1 }
   0x4   :  { %p1792_p2 = pnand %p1790_p1, %p1787_p0 }
   0x6   :  { %1795 = shalt.err (!%p1792_p2)
}
   0x7   :  { %s1796_s21 = scalar_lea.vmem %s17_s13, 16384  ;;  %p1801_p4 = scmp.lt.s32.totalorder %s17_s13, %s17_s13 }
   0x8   :  { %p1797_p3 = scmp.ne.s32.totalorder %s17_s13, %s1796_s21  ;;  %p1802_p5 = scmp.lt.s32.totalorder %s1796_s21, %s1796_s21 }
   0xa   :  { %p1803_p6 = por %p1802_p5, %p1801_p4 }
   0xc   :  { %p1804_p7 = pnand %p1803_p6, %p1797_p3 }
   0xe   :  { %1807 = shalt.err (!%p1804_p7)
}
   0xf   :  { %s1811_s22 = smov 128   ;;  %s1812_s23 = smov 8  }
  0x10   :  { %22 = dma.hbm_to_vmem [thread:$0]  %s1937_s1, 16384, %s17_s13, [#allocation3], %s1811_s22, %s1811_s22, %s1812_s23  }
  0x11   :  { %1808 = dma.done.wait [#allocation3], 16384  }
  0x12   :  { %1809 = vsyncadd [#allocation3], 4294950912  ;;  %v35_v0 = vld [vmem:[#allocation2] sm:$0xff]  ;;  %v36_v1 = vld [vmem:[#allocation2 + $0x8] sm:$0xff] }
  0x13   :  { %v37_v2 = vld [vmem:[#allocation2 + $0x10] sm:$0xff]  ;;  %v1502_v3 = vpack.c.bf16 %v36_v1, %v35_v0  ;;  %v38_v4 = vld [vmem:[#allocation2 + $0x18] sm:$0xff]  ;;  %v39_v6 = vld [vmem:[#allocation2 + $0x20] sm:$0xff] }
  0x14   :  { %v1506_v5 = vpack.c.bf16 %v38_v4, %v37_v2  ;;  %v40_v7 = vld [vmem:[#allocation2 + $0x28] sm:$0xff]  ;;  %v41_v9 = vld [vmem:[#allocation2 + $0x30] sm:$0xff]  ;;  %v42_v10 = vld [vmem:[#allocation2 + $0x38] sm:$0xff]  ;;  %v28_v4 = vlaneseq }
  0x15   :  { %1503 = vmatprep.subr.bf16.mxu0 %v1502_v3  ;;  %v1510_v8 = vpack.c.bf16 %v40_v7, %v39_v6  ;;  %v33_v11 = vld [vmem:[%s1936_s0] sm:$0xff]  ;;  %v135_v13 = vld [vmem:[#allocation2 + $0x88] sm:$0xff]  ;;  %v136_v14 = vld [vmem:[#allocation2 + $0x90] sm:$0xff]  ;;  %v1514_v20 = vpack.c.bf16 %v42_v10, %v41_v9 }
  0x16   :  { %1505 = vmatpush3.bf16.msra.mxu0 %v1502_v3  ;;  %1254 = vmatprep.mubr.f32.mxu0 %v33_v11  ;;  %v134_v12 = vld [vmem:[#allocation2 + $0x80] sm:$0xff]  ;;  %v137_v16 = vld [vmem:[#allocation2 + $0x98] sm:$0xff]  ;;  %v139_v19 = vld [vmem:[#allocation2 + $0xa8] sm:$0xff] }
  0x17   :  { %1507 = vmatprep.subr.bf16.mxu0 %v1506_v5  ;;  %v1534_v15 = vpack.c.bf16 %v135_v13, %v134_v12  ;;  %v1538_v17 = vpack.c.bf16 %v137_v16, %v136_v14  ;;  %v138_v18 = vld [vmem:[#allocation2 + $0xa0] sm:$0xff]  ;;  %v44_v22 = vld [vmem:[#allocation2 + $0x48] sm:$0xff]  ;;  %v140_v24 = vld [vmem:[#allocation2 + $0xb0] sm:$0xff] }
  0x18   :  { %v43_v21 = vld [vmem:[#allocation2 + $0x40] sm:$0xff]  ;;  %v1542_v23 = vpack.c.bf16 %v139_v19, %v138_v18  ;;  %v141_v25 = vld [vmem:[#allocation2 + $0xb8] sm:$0xff]  ;;  %v45_v27 = vld [vmem:[#allocation2 + $0x50] sm:$0xff] }
  0x19   :  { %1535 = vmatprep.subr.bf16.mxu1 %v1534_v15  ;;  %v1518_v26 = vpack.c.bf16 %v44_v22, %v43_v21  ;;  %v46_v28 = vld [vmem:[#allocation2 + $0x58] sm:$0xff]  ;;  %v1546_v29 = vpack.c.bf16 %v141_v25, %v140_v24  ;;  %v142_v30 = vld [vmem:[#allocation2 + $0xc0] sm:$0xff]  ;;  %v143_v31 = vld [vmem:[#allocation2 + $0xc8] sm:$0xff] }
  0x1a   :  { %1509 = vmatpush3.bf16.msra.mxu0 %v1506_v5  ;;  %1537 = vmatpush3.bf16.msra.mxu1 %v1534_v15  ;;  %v1522_v32 = vpack.c.bf16 %v46_v28, %v45_v27  ;;  %v47_v33 = vld [vmem:[#allocation2 + $0x60] sm:$0xff]  ;;  %v48_v34 = vld [vmem:[#allocation2 + $0x68] sm:$0xff]  ;;  %v1550_v35 = vpack.c.bf16 %v143_v31, %v142_v30  ;;  %v144_v36 = vld [vmem:[#allocation2 + $0xd0] sm:$0xff]  ;;  %v29_v5 = vand.u32 127, %v28_v4 }
  0x1b   :  { %1511 = vmatprep.subr.bf16.mxu0 %v1510_v8  ;;  %1539 = vmatprep.subr.bf16.mxu1 %v1538_v17  ;;  %v145_v37 = vld [vmem:[#allocation2 + $0xd8] sm:$0xff]  ;;  %v1526_v38 = vpack.c.bf16 %v48_v34, %v47_v33  ;;  %v49_v39 = vld [vmem:[#allocation2 + $0x70] sm:$0xff]  ;;  %v146_v42 = vld [vmem:[#allocation2 + $0xe0] sm:$0xff] }
  0x1c   :  { %v50_v40 = vld [vmem:[#allocation2 + $0x78] sm:$0xff]  ;;  %v1554_v41 = vpack.c.bf16 %v145_v37, %v144_v36  ;;  %v147_v43 = vld [vmem:[#allocation2 + $0xe8] sm:$0xff]  ;;  %v148_v47 = vld [vmem:[#allocation2 + $0xf0] sm:$0xff]  ;;  %vm30_vm0 = vcmp.lt.s32.totalorder %v29_v5, 64 }
  0x1d   :  { %v1530_v44 = vpack.c.bf16 %v50_v40, %v49_v39  ;;  %v1558_v45 = vpack.c.bf16 %v147_v43, %v146_v42  ;;  %v34_v46 = vld [vmem:[%s1936_s0 + $0x8] sm:$0xff]  ;;  %v149_v48 = vld [vmem:[#allocation2 + $0xf8] sm:$0xff]  ;;  %v1047_v50 = vld [vmem:[%s1938_s2] ss:$0 sm:$0xff] }
  0x1e   :  { %1513 = vmatpush3.bf16.msra.mxu0 %v1510_v8  ;;  %1541 = vmatpush3.bf16.msra.mxu1 %v1538_v17  ;;  %v1562_v49 = vpack.c.bf16 %v149_v48, %v148_v47  ;;  %v1049_v55 = vld [vmem:[%s1938_s2 + $0x1] ss:$0 sm:$0xff]  ;;  %v281_v63 = vld [vmem:[#allocation2 + $0x108] sm:$0xff]  ;;  %v282_v0 = vld [vmem:[#allocation2 + $0x110] sm:$0xff]  ;;  %v1813_v8 = vmov 0.0  }
  0x1f   :  { %1515 = vmatprep.subr.bf16.mxu0 %v1514_v20  ;;  %1543 = vmatprep.subr.bf16.mxu1 %v1542_v23  ;;  %v280_v62 = vld [vmem:[#allocation2 + $0x100] sm:$0xff]  ;;  %v283_v2 = vld [vmem:[#allocation2 + $0x118] sm:$0xff]  ;;  %v1858_v9 = vsel %vm30_vm0, 1.0, %v1813_v8  ;;  %v285_v19 = vld [vmem:[#allocation2 + $0x128] sm:$0xff] }
  0x20   :  { %v1566_v1 = vpack.c.bf16 %v281_v63, %v280_v62  ;;  %v1570_v3 = vpack.c.bf16 %v283_v2, %v282_v0  ;;  %v284_v18 = vld [vmem:[#allocation2 + $0x120] sm:$0xff]  ;;  %v286_v21 = vld [vmem:[#allocation2 + $0x130] sm:$0xff]  ;;  %v287_v22 = vld [vmem:[#allocation2 + $0x138] sm:$0xff] }
  0x21   :  { %v288_v24 = vld [vmem:[#allocation2 + $0x140] sm:$0xff]  ;;  %v289_v25 = vld [vmem:[#allocation2 + $0x148] sm:$0xff]  ;;  %v290_v27 = vld [vmem:[#allocation2 + $0x150] sm:$0xff] }
  0x22   :  { %1517 = vmatpush3.bf16.msra.mxu0 %v1514_v20  ;;  %1545 = vmatpush3.bf16.msra.mxu1 %v1542_v23  ;;  %v1574_v20 = vpack.c.bf16 %v285_v19, %v284_v18  ;;  %v1578_v23 = vpack.c.bf16 %v287_v22, %v286_v21  ;;  %v291_v28 = vld [vmem:[#allocation2 + $0x158] sm:$0xff]  ;;  %v293_v31 = vld [vmem:[#allocation2 + $0x168] sm:$0xff]  ;;  %v294_v33 = vld [vmem:[#allocation2 + $0x170] sm:$0xff] }
  0x23   :  { %1519 = vmatprep.subr.bf16.mxu0 %v1518_v26  ;;  %1547 = vmatprep.subr.bf16.mxu1 %v1546_v29  ;;  %v1586_v30 = vpack.c.bf16 %v291_v28, %v290_v27  ;;  %v295_v34 = vld [vmem:[#allocation2 + $0x178] sm:$0xff]  ;;  %v382_v36 = vld [vmem:[#allocation2 + $0x180] sm:$0xff]  ;;  %v383_v37 = vld [vmem:[#allocation2 + $0x188] sm:$0xff] }
  0x24   :  { %v1598_v39 = vpack.c.bf16 %v383_v37, %v382_v36  ;;  %v385_v40 = vld [vmem:[#allocation2 + $0x198] sm:$0xff]  ;;  %v386_v42 = vld [vmem:[#allocation2 + $0x1a0] sm:$0xff]  ;;  %v387_v43 = vld [vmem:[#allocation2 + $0x1a8] sm:$0xff] }
  0x25   :  { %v390_v48 = vld [vmem:[#allocation2 + $0x1c0] sm:$0xff]  ;;  %v529_v28 = vld [vmem:[#allocation2 + $0x208] sm:$0xff] }
  0x26   :  { %1521 = vmatpush3.bf16.msra.mxu0 %v1518_v26  ;;  %1549 = vmatpush3.bf16.msra.mxu1 %v1546_v29  ;;  %v1582_v26 = vpack.c.bf16 %v289_v25, %v288_v24  ;;  %v292_v29 = vld [vmem:[#allocation2 + $0x160] sm:$0xff] }
  0x27   :  { %1523 = vmatprep.subr.bf16.mxu0 %v1522_v32  ;;  %1551 = vmatprep.subr.bf16.mxu1 %v1550_v35  ;;  %v1052_v0 = vld [vmem:[%s1938_s2 + $0x4] ss:$0 sm:$0xff]  ;;  %v1053_v2 = vld [vmem:[%s1938_s2 + $0x5] ss:$0 sm:$0xff] }
  0x28   :  { %v528_v27 = vld [vmem:[#allocation2 + $0x200] sm:$0xff] }
  0x2a   :  { %1525 = vmatpush3.bf16.msra.mxu0 %v1522_v32  ;;  %1553 = vmatpush3.bf16.msra.mxu1 %v1550_v35  ;;  %v1590_v32 = vpack.c.bf16 %v293_v31, %v292_v29  ;;  %v1594_v35 = vpack.c.bf16 %v295_v34, %v294_v33  ;;  %v530_v29 = vld [vmem:[#allocation2 + $0x210] sm:$0xff]  ;;  %v531_v31 = vld [vmem:[#allocation2 + $0x218] sm:$0xff]  ;;  %v532_v33 = vld [vmem:[#allocation2 + $0x220] sm:$0xff] }
  0x2b   :  { %1527 = vmatprep.subr.bf16.mxu0 %v1526_v38  ;;  %1555 = vmatprep.subr.bf16.mxu1 %v1554_v41  ;;  %v533_v34 = vld [vmem:[#allocation2 + $0x228] sm:$0xff] }
  0x2e   :  { %1529 = vmatpush3.bf16.msra.mxu0 %v1526_v38  ;;  %1557 = vmatpush3.bf16.msra.mxu1 %v1554_v41  ;;  %v384_v38 = vld [vmem:[#allocation2 + $0x190] sm:$0xff] }
  0x2f   :  { %1531 = vmatprep.subr.bf16.mxu0 %v1530_v44  ;;  %1559 = vmatprep.subr.bf16.mxu1 %v1558_v45  ;;  %v1602_v41 = vpack.c.bf16 %v385_v40, %v384_v38 }
  0x32   :  { %1533 = vmatpush3.bf16.msra.mxu0 %v1530_v44  ;;  %1561 = vmatpush3.bf16.msra.mxu1 %v1558_v45  ;;  %v1606_v44 = vpack.c.bf16 %v387_v43, %v386_v42  ;;  %v388_v45 = vld [vmem:[#allocation2 + $0x1b0] sm:$0xff] }
  0x33   :  { %1563 = vmatprep.subr.bf16.mxu1 %v1562_v49  ;;  %1567 = vmatprep.subr.bf16.mxu0 %v1566_v1 }
  0x35   :  { %1255 = vmatmul.mubr.f32.vlgmr.msra.gmra.mrb[0].mxu0 %v34_v46  ;;  %v389_v46 = vld [vmem:[#allocation2 + $0x1b8] sm:$0xff] }
  0x36   :  { %1565 = vmatpush3.bf16.msra.mxu1 %v1562_v49  ;;  %1569 = vmatpush3.bf16.msra.mxu0 %v1566_v1  ;;  %v1610_v47 = vpack.c.bf16 %v389_v46, %v388_v45  ;;  %v391_v49 = vld [vmem:[#allocation2 + $0x1c8] sm:$0xff]  ;;  %v534_v46 = vld [vmem:[#allocation2 + $0x230] sm:$0xff] }
  0x37   :  { %1571 = vmatprep.subr.bf16.mxu0 %v1570_v3  ;;  %1599 = vmatprep.subr.bf16.mxu1 %v1598_v39 }
  0x3a   :  { %1573 = vmatpush3.bf16.msra.mxu0 %v1570_v3 }
  0x3b   :  { %1575 = vmatprep.subr.bf16.mxu0 %v1574_v20 }
  0x3e   :  { %1577 = vmatpush3.bf16.msra.mxu0 %v1574_v20  ;;  %v1057_v20 = vld [vmem:[%s1938_s2 + $0x3] ss:$0 sm:$0xff] }
  0x3f   :  { %1579 = vmatprep.subr.bf16.mxu0 %v1578_v23 }
  0x42   :  { %1581 = vmatpush3.bf16.msra.mxu0 %v1578_v23 }
  0x43   :  { %1583 = vmatprep.subr.bf16.mxu0 %v1582_v26 }
  0x46   :  { %1585 = vmatpush3.bf16.msra.mxu0 %v1582_v26 }
  0x47   :  { %1587 = vmatprep.subr.bf16.mxu0 %v1586_v30 }
  0x4a   :  { %1589 = vmatpush3.bf16.msra.mxu0 %v1586_v30  ;;  %v1630_v30 = vpack.c.bf16 %v529_v28, %v528_v27  ;;  %v678_v27 = vld [vmem:[#allocation2 + $0x2a0] sm:$0xff]  ;;  %v679_v28 = vld [vmem:[#allocation2 + $0x2a8] sm:$0xff] }
  0x4b   :  { %1591 = vmatprep.subr.bf16.mxu0 %v1590_v32 }
  0x4e   :  { %1593 = vmatpush3.bf16.msra.mxu0 %v1590_v32  ;;  %v1634_v32 = vpack.c.bf16 %v531_v31, %v530_v29  ;;  %v1670_v29 = vpack.c.bf16 %v679_v28, %v678_v27 }
  0x4f   :  { %1595 = vmatprep.subr.bf16.mxu0 %v1594_v35 }
  0x52   :  { %1597 = vmatpush3.bf16.msra.mxu0 %v1594_v35  ;;  %v1638_v35 = vpack.c.bf16 %v533_v34, %v532_v33 }
  0x53   :  { %1631 = vmatprep.subr.bf16.mxu0 %v1630_v30 }
 0x108   :  { %v1256_v51 = vpop.f32.mrb[0].mxu0 }
 0x109   :  { %v124_v52 = vpop.f32.mrb[1].mxu0  ;;  %v130_v54 = vadd.f32 %v1256_v51, %v1047_v50  ;;  %v392_v51 = vld [vmem:[#allocation2 + $0x1d0] sm:$0xff] }
 0x10a   :  { %v125_v53 = vadd.f32 %v1047_v50, %v124_v52  ;;  %v1614_v50 = vpack.c.bf16 %v391_v49, %v390_v48  ;;  %v393_v52 = vld [vmem:[#allocation2 + $0x1d8] sm:$0xff]  ;;  %v536_v49 = vld [vmem:[#allocation2 + $0x240] sm:$0xff] }
 0x10c   :  { %1289 = vmatprep.mubr.f32.mxu1 %v125_v53 }
 0x10d   :  { %1290 = vmatmul.mubr.f32.vlgmr.msra.gmra.mrb[0].mxu1 %v130_v54 }
 0x10e   :  { %1601 = vmatpush3.bf16.msra.mxu1 %v1598_v39 }
 0x10f   :  { %1603 = vmatprep.subr.bf16.mxu1 %v1602_v41 }
 0x112   :  { %1605 = vmatpush3.bf16.msra.mxu1 %v1602_v41 }
 0x113   :  { %1607 = vmatprep.subr.bf16.mxu1 %v1606_v44 }
 0x116   :  { %1609 = vmatpush3.bf16.msra.mxu1 %v1606_v44 }
 0x117   :  { %1611 = vmatprep.subr.bf16.mxu1 %v1610_v47 }
 0x11a   :  { %1613 = vmatpush3.bf16.msra.mxu1 %v1610_v47  ;;  %v535_v47 = vld [vmem:[#allocation2 + $0x238] sm:$0xff] }
 0x11b   :  { %1615 = vmatprep.subr.bf16.mxu1 %v1614_v50  ;;  %v1642_v48 = vpack.c.bf16 %v535_v47, %v534_v46  ;;  %v684_v46 = vld [vmem:[#allocation2 + $0x2d0] sm:$0xff]  ;;  %v685_v47 = vld [vmem:[#allocation2 + $0x2d8] sm:$0xff] }
 0x11e   :  { %1617 = vmatpush3.bf16.msra.mxu1 %v1614_v50  ;;  %v537_v50 = vld [vmem:[#allocation2 + $0x248] sm:$0xff] }
 0x1e0   :  { %v1291_v56 = vpop.f32.mrb[0].mxu1 }
 0x1e1   :  { %v224_v57 = vpop.f32.mrb[1].mxu1  ;;  %v230_v59 = vadd.f32 %v1291_v56, %v1049_v55 }
 0x1e2   :  { %v225_v58 = vadd.f32 %v1049_v55, %v224_v57  ;;  %v395_v55 = vld [vmem:[#allocation2 + $0x1e8] sm:$0xff] }
 0x1e3   :  { %v234_v61 = vadd.f32 %v230_v59, %v130_v54  ;;  %v394_v54 = vld [vmem:[#allocation2 + $0x1e0] sm:$0xff] }
 0x1e4   :  { %v233_v60 = vadd.f32 %v225_v58, %v125_v53  ;;  %v1618_v53 = vpack.c.bf16 %v393_v52, %v392_v51  ;;  %v1622_v56 = vpack.c.bf16 %v395_v55, %v394_v54  ;;  %v1646_v51 = vpack.c.bf16 %v537_v50, %v536_v49  ;;  %v538_v52 = vld [vmem:[#allocation2 + $0x250] sm:$0xff]  ;;  %v540_v55 = vld [vmem:[#allocation2 + $0x260] sm:$0xff]  ;;  %v687_v50 = vld [vmem:[#allocation2 + $0x2e8] sm:$0xff] }
 0x1e5   :  { %v686_v49 = vld [vmem:[#allocation2 + $0x2e0] sm:$0xff] }
 0x1e6   :  { %239 = vadd.xlane.f32.xlu0 %v233_v60  ;;  %1619 = vmatprep.subr.bf16.mxu1 %v1618_v53 }
 0x1e7   :  { %1621 = vmatpush3.bf16.msra.mxu1 %v1618_v53  ;;  %v539_v53 = vld [vmem:[#allocation2 + $0x258] sm:$0xff] }
 0x1e8   :  { %1623 = vmatprep.subr.bf16.mxu1 %v1622_v56  ;;  %v1650_v54 = vpack.c.bf16 %v539_v53, %v538_v52  ;;  %v688_v52 = vld [vmem:[#allocation2 + $0x2f0] sm:$0xff]  ;;  %v689_v53 = vld [vmem:[#allocation2 + $0x2f8] sm:$0xff] }
 0x1ea   :  { %241 = vadd.xlane.f32.xlu0 %v234_v61 }
 0x1eb   :  { %1625 = vmatpush3.bf16.msra.mxu1 %v1622_v56  ;;  %v541_v56 = vld [vmem:[#allocation2 + $0x268] sm:$0xff] }
 0x273   :  { %v240_v6 = vpop.xlane.xlu0 %239 }
 0x274   :  { %v243_v7 = vmul.f32 0.015625, %v240_v6 }
 0x276   :  { %v245_v10 = vsub.f32 %v233_v60, %v243_v7 }
 0x277   :  { %v242_v11 = vpop.xlane.xlu0 %241 }
 0x278   :  { %v244_v12 = vmul.f32 0.015625, %v242_v11  ;;  %v1861_v13 = vmul.f32 %v1858_v9, %v245_v10  ;;  %v396_v10 = vld [vmem:[#allocation2 + $0x1f0] sm:$0xff]  ;;  %v397_v11 = vld [vmem:[#allocation2 + $0x1f8] sm:$0xff] }
 0x27a   :  { %v246_v14 = vsub.f32 %v234_v61, %v244_v12  ;;  %v249_v15 = vmul.f32 %v1861_v13, %v1861_v13  ;;  %v1626_v12 = vpack.c.bf16 %v397_v11, %v396_v10 }
 0x27c   :  { %251 = vadd.xlane.f32.xlu1 %v249_v15  ;;  %v1866_v16 = vmul.f32 %v1858_v9, %v246_v14  ;;  %1627 = vmatprep.subr.bf16.mxu1 %v1626_v12 }
 0x27d   :  { %1629 = vmatpush3.bf16.msra.mxu1 %v1626_v12 }
 0x27e   :  { %v250_v17 = vmul.f32 %v1866_v16, %v1866_v16 }
 0x280   :  { %253 = vadd.xlane.f32.xlu1 %v250_v17 }
 0x309   :  { %v252_v57 = vpop.xlane.xlu1 %251 }
 0x30a   :  { %v255_v58 = vmul.f32 0.015625, %v252_v57  ;;  %v1654_v57 = vpack.c.bf16 %v541_v56, %v540_v55  ;;  %v776_v55 = vld [vmem:[#allocation2 + $0x300] sm:$0xff]  ;;  %v777_v56 = vld [vmem:[#allocation2 + $0x308] sm:$0xff] }
 0x30c   :  { %v257_v59 = vadd.f32 1e-05, %v255_v58  ;;  %v542_v58 = vld [vmem:[#allocation2 + $0x270] sm:$0xff] }
 0x30d   :  { %v254_v60 = vpop.xlane.xlu1 %253 }
 0x30e   :  { %1762 = vrsqrt.f32 %v257_v59  ;;  %v256_v61 = vmul.f32 0.015625, %v254_v60  ;;  %v543_v59 = vld [vmem:[#allocation2 + $0x278] sm:$0xff] }
 0x30f   :  { %v1658_v60 = vpack.c.bf16 %v543_v59, %v542_v58  ;;  %v1694_v58 = vpack.c.bf16 %v777_v56, %v776_v55  ;;  %v779_v59 = vld [vmem:[#allocation2 + $0x318] sm:$0xff] }
 0x310   :  { %v258_v62 = vadd.f32 1e-05, %v256_v61 }
 0x312   :  { %1764 = vrsqrt.f32 %v258_v62 }
 0x318   :  { %v1763_v63 = vpop.eup %1762 }
 0x319   :  { %v261_v1 = vmul.f32 %v1763_v63, %v1861_v13  ;;  %v1055_v13 = vld [vmem:[%s1938_s2 + $0x2] ss:$0 sm:$0xff] }
 0x31b   :  { %v269_v3 = vmul.f32 %v1052_v0, %v261_v1 }
 0x31c   :  { %v1765_v4 = vpop.eup %1764 }
 0x31d   :  { %v262_v5 = vmul.f32 %v1765_v4, %v1866_v16  ;;  %v277_v6 = vadd.f32 %v1053_v2, %v269_v3  ;;  %v1060_v4 = vld [vmem:[%s1938_s2 + $0x6] ss:$0 sm:$0xff] }
 0x31f   :  { %v270_v7 = vmul.f32 %v1052_v0, %v262_v5  ;;  %1324 = vmatprep.mubr.f32.mxu0 %v277_v6 }
 0x321   :  { %v278_v8 = vadd.f32 %v1053_v2, %v270_v7 }
 0x323   :  { %1325 = vmatmul.mubr.f32.vlgmr.msra.gmra.mrb[2].mxu0 %v278_v8 }
 0x324   :  { %1633 = vmatpush3.bf16.msra.mxu0 %v1630_v30 }
 0x325   :  { %1635 = vmatprep.subr.bf16.mxu0 %v1634_v32 }
 0x328   :  { %1637 = vmatpush3.bf16.msra.mxu0 %v1634_v32 }
 0x329   :  { %1639 = vmatprep.subr.bf16.mxu0 %v1638_v35 }
 0x32c   :  { %1641 = vmatpush3.bf16.msra.mxu0 %v1638_v35 }
 0x32d   :  { %1643 = vmatprep.subr.bf16.mxu0 %v1642_v48 }
 0x330   :  { %1645 = vmatpush3.bf16.msra.mxu0 %v1642_v48  ;;  %v1682_v48 = vpack.c.bf16 %v685_v47, %v684_v46  ;;  %v922_v46 = vld [vmem:[#allocation2 + $0x380] sm:$0xff]  ;;  %v923_v47 = vld [vmem:[#allocation2 + $0x388] sm:$0xff] }
 0x331   :  { %1647 = vmatprep.subr.bf16.mxu0 %v1646_v51 }
 0x334   :  { %1649 = vmatpush3.bf16.msra.mxu0 %v1646_v51  ;;  %v1686_v51 = vpack.c.bf16 %v687_v50, %v686_v49  ;;  %v1726_v49 = vpack.c.bf16 %v923_v47, %v922_v46  ;;  %v925_v50 = vld [vmem:[#allocation2 + $0x398] sm:$0xff] }
 0x335   :  { %1651 = vmatprep.subr.bf16.mxu0 %v1650_v54 }
 0x338   :  { %1653 = vmatpush3.bf16.msra.mxu0 %v1650_v54  ;;  %v1690_v54 = vpack.c.bf16 %v689_v53, %v688_v52  ;;  %v926_v52 = vld [vmem:[#allocation2 + $0x3a0] sm:$0xff]  ;;  %v927_v53 = vld [vmem:[#allocation2 + $0x3a8] sm:$0xff] }
 0x339   :  { %1655 = vmatprep.subr.bf16.mxu0 %v1654_v57 }
 0x33c   :  { %1657 = vmatpush3.bf16.msra.mxu0 %v1654_v57  ;;  %v778_v57 = vld [vmem:[#allocation2 + $0x310] sm:$0xff] }
 0x33d   :  { %1659 = vmatprep.subr.bf16.mxu0 %v1658_v60 }
 0x340   :  { %1661 = vmatpush3.bf16.msra.mxu0 %v1658_v60  ;;  %v1698_v60 = vpack.c.bf16 %v779_v59, %v778_v57 }
 0x341   :  { %1695 = vmatprep.subr.bf16.mxu0 %v1694_v58 }
 0x3f6   :  { %v1326_v14 = vpop.f32.mrb[2].mxu0 }
 0x3f7   :  { %v376_v15 = vadd.f32 %v1326_v14, %v1055_v13  ;;  %v370_v17 = vpop.f32.mrb[3].mxu0  ;;  %v1063_v14 = vld [vmem:[%s1938_s2 + $0x8] ss:$0 sm:$0xff] }
 0x3f8   :  { %v371_v18 = vadd.f32 %v1055_v13, %v370_v17 }
 0x3f9   :  { %v380_v16 = vmax.f32 %v376_v15, 0.0 }
 0x3fa   :  { %v379_v19 = vmax.f32 %v371_v18, 0.0 }
 0x3fc   :  { %1359 = vmatprep.mubr.f32.mxu1 %v379_v19 }
 0x3fd   :  { %1360 = vmatmul.mubr.f32.vlgmr.msra.gmra.mrb[2].mxu1 %v380_v16 }
 0x4d0   :  { %v1361_v21 = vpop.f32.mrb[2].mxu1 }
 0x4d1   :  { %v478_v22 = vadd.f32 %v1361_v21, %v1057_v20  ;;  %v472_v23 = vpop.f32.mrb[3].mxu1  ;;  %v674_v21 = vld [vmem:[#allocation2 + $0x280] sm:$0xff] }
 0x4d2   :  { %v473_v24 = vadd.f32 %v1057_v20, %v472_v23  ;;  %v676_v23 = vld [vmem:[#allocation2 + $0x290] sm:$0xff] }
 0x4d3   :  { %v482_v25 = vadd.f32 %v478_v22, %v278_v8  ;;  %v1061_v8 = vld [vmem:[%s1938_s2 + $0x7] ss:$0 sm:$0xff]  ;;  %v675_v22 = vld [vmem:[#allocation2 + $0x288] sm:$0xff] }
 0x4d4   :  { %v481_v26 = vadd.f32 %v473_v24, %v277_v6  ;;  %v1662_v24 = vpack.c.bf16 %v675_v22, %v674_v21 }
 0x4d5   :  { %489 = vadd.xlane.f32.xlu1 %v482_v25 }
 0x4d6   :  { %487 = vadd.xlane.f32.xlu0 %v481_v26  ;;  %1663 = vmatprep.subr.bf16.mxu1 %v1662_v24 }
 0x4d7   :  { %1665 = vmatpush3.bf16.msra.mxu1 %v1662_v24  ;;  %v1067_v24 = vld [vmem:[%s1938_s2 + $0xc] ss:$0 sm:$0xff] }
 0x562   :  { %v490_v36 = vpop.xlane.xlu1 %489 }
 0x563   :  { %v492_v37 = vmul.f32 0.015625, %v490_v36  ;;  %v488_v38 = vpop.xlane.xlu0 %487 }
 0x564   :  { %v491_v39 = vmul.f32 0.015625, %v488_v38 }
 0x565   :  { %v494_v40 = vsub.f32 %v482_v25, %v492_v37  ;;  %v677_v25 = vld [vmem:[#allocation2 + $0x298] sm:$0xff] }
 0x566   :  { %v493_v41 = vsub.f32 %v481_v26, %v491_v39  ;;  %v1666_v26 = vpack.c.bf16 %v677_v25, %v676_v23 }
 0x567   :  { %v496_v42 = vmul.f32 %v1858_v9, %v494_v40  ;;  %v680_v40 = vld [vmem:[#allocation2 + $0x2b0] sm:$0xff] }
 0x568   :  { %v495_v43 = vmul.f32 %v1858_v9, %v493_v41  ;;  %1667 = vmatprep.subr.bf16.mxu1 %v1666_v26  ;;  %v681_v41 = vld [vmem:[#allocation2 + $0x2b8] sm:$0xff] }
 0x569   :  { %v498_v44 = vmul.f32 %v496_v42, %v496_v42  ;;  %1669 = vmatpush3.bf16.msra.mxu1 %v1666_v26 }
 0x56a   :  { %v497_v45 = vmul.f32 %v495_v43, %v495_v43  ;;  %1671 = vmatprep.subr.bf16.mxu1 %v1670_v29 }
 0x56b   :  { %501 = vadd.xlane.f32.xlu1 %v498_v44  ;;  %v683_v44 = vld [vmem:[#allocation2 + $0x2c8] sm:$0xff] }
 0x56c   :  { %499 = vadd.xlane.f32.xlu0 %v497_v45 }
 0x56d   :  { %1673 = vmatpush3.bf16.msra.mxu1 %v1670_v29  ;;  %v790_v29 = vld [vmem:[#allocation2 + $0x370] sm:$0xff] }
 0x5f8   :  { %v502_v61 = vpop.xlane.xlu1 %501 }
 0x5f9   :  { %v504_v62 = vmul.f32 0.015625, %v502_v61  ;;  %v500_v63 = vpop.xlane.xlu0 %499  ;;  %v780_v61 = vld [vmem:[#allocation2 + $0x320] sm:$0xff] }
 0x5fa   :  { %v503_v0 = vmul.f32 0.015625, %v500_v63 }
 0x5fb   :  { %v506_v1 = vadd.f32 1e-05, %v504_v62  ;;  %v781_v62 = vld [vmem:[#allocation2 + $0x328] sm:$0xff] }
 0x5fc   :  { %v505_v2 = vadd.f32 1e-05, %v503_v0  ;;  %v1702_v63 = vpack.c.bf16 %v781_v62, %v780_v61  ;;  %v782_v0 = vld [vmem:[#allocation2 + $0x330] sm:$0xff] }
 0x5fd   :  { %1766 = vrsqrt.f32 %v506_v1  ;;  %v783_v1 = vld [vmem:[#allocation2 + $0x338] sm:$0xff] }
 0x5fe   :  { %1768 = vrsqrt.f32 %v505_v2  ;;  %v1706_v2 = vpack.c.bf16 %v783_v1, %v782_v0  ;;  %v928_v1 = vld [vmem:[#allocation2 + $0x3b0] sm:$0xff] }
 0x607   :  { %v1767_v3 = vpop.eup %1766 }
 0x608   :  { %v1769_v5 = vpop.eup %1768  ;;  %v510_v6 = vmul.f32 %v1767_v3, %v496_v42  ;;  %v1674_v42 = vpack.c.bf16 %v681_v41, %v680_v40  ;;  %v784_v3 = vld [vmem:[#allocation2 + $0x340] sm:$0xff] }
 0x609   :  { %v509_v7 = vmul.f32 %v1769_v5, %v495_v43  ;;  %v682_v43 = vld [vmem:[#allocation2 + $0x2c0] sm:$0xff] }
 0x60a   :  { %v518_v10 = vmul.f32 %v1060_v4, %v510_v6  ;;  %1675 = vmatprep.subr.bf16.mxu1 %v1674_v42  ;;  %v1678_v45 = vpack.c.bf16 %v683_v44, %v682_v43  ;;  %v786_v6 = vld [vmem:[#allocation2 + $0x350] sm:$0xff] }
 0x60b   :  { %v517_v11 = vmul.f32 %v1060_v4, %v509_v7  ;;  %1677 = vmatpush3.bf16.msra.mxu1 %v1674_v42  ;;  %v785_v4 = vld [vmem:[#allocation2 + $0x348] sm:$0xff]  ;;  %v787_v7 = vld [vmem:[#allocation2 + $0x358] sm:$0xff] }
 0x60c   :  { %v526_v13 = vadd.f32 %v1061_v8, %v518_v10  ;;  %1679 = vmatprep.subr.bf16.mxu1 %v1678_v45  ;;  %v1710_v5 = vpack.c.bf16 %v785_v4, %v784_v3  ;;  %v788_v10 = vld [vmem:[#allocation2 + $0x360] sm:$0xff] }
 0x60d   :  { %v525_v12 = vadd.f32 %v1061_v8, %v517_v11  ;;  %v1714_v8 = vpack.c.bf16 %v787_v7, %v786_v6  ;;  %v789_v11 = vld [vmem:[#allocation2 + $0x368] sm:$0xff]  ;;  %v930_v4 = vld [vmem:[#allocation2 + $0x3c0] sm:$0xff]  ;;  %v932_v7 = vld [vmem:[#allocation2 + $0x3d0] sm:$0xff] }
 0x60f   :  { %1394 = vmatprep.mubr.f32.mxu0 %v525_v12  ;;  %1681 = vmatpush3.bf16.msra.mxu1 %v1678_v45 }
 0x610   :  { %1395 = vmatmul.mubr.f32.vlgmr.msra.gmra.mrb[4].mxu0 %v526_v13  ;;  %1683 = vmatprep.subr.bf16.mxu1 %v1682_v48 }
 0x611   :  { %1697 = vmatpush3.bf16.msra.mxu0 %v1694_v58 }
 0x612   :  { %1699 = vmatprep.subr.bf16.mxu0 %v1698_v60 }
 0x613   :  { %1685 = vmatpush3.bf16.msra.mxu1 %v1682_v48  ;;  %v924_v48 = vld [vmem:[#allocation2 + $0x390] sm:$0xff] }
 0x614   :  { %1687 = vmatprep.subr.bf16.mxu1 %v1686_v51 }
 0x615   :  { %1701 = vmatpush3.bf16.msra.mxu0 %v1698_v60 }
 0x616   :  { %1703 = vmatprep.subr.bf16.mxu0 %v1702_v63 }
 0x617   :  { %1689 = vmatpush3.bf16.msra.mxu1 %v1686_v51  ;;  %v1730_v51 = vpack.c.bf16 %v925_v50, %v924_v48 }
 0x618   :  { %1691 = vmatprep.subr.bf16.mxu1 %v1690_v54 }
 0x619   :  { %1705 = vmatpush3.bf16.msra.mxu0 %v1702_v63 }
 0x61a   :  { %1707 = vmatprep.subr.bf16.mxu0 %v1706_v2 }
 0x61b   :  { %1693 = vmatpush3.bf16.msra.mxu1 %v1690_v54  ;;  %v1734_v54 = vpack.c.bf16 %v927_v53, %v926_v52 }
 0x61c   :  { %1727 = vmatprep.subr.bf16.mxu1 %v1726_v49 }
 0x61d   :  { %1709 = vmatpush3.bf16.msra.mxu0 %v1706_v2  ;;  %v929_v2 = vld [vmem:[#allocation2 + $0x3b8] sm:$0xff] }
 0x61e   :  { %1711 = vmatprep.subr.bf16.mxu0 %v1710_v5  ;;  %v1738_v3 = vpack.c.bf16 %v929_v2, %v928_v1 }
 0x621   :  { %1713 = vmatpush3.bf16.msra.mxu0 %v1710_v5  ;;  %v931_v5 = vld [vmem:[#allocation2 + $0x3c8] sm:$0xff] }
 0x622   :  { %1715 = vmatprep.subr.bf16.mxu0 %v1714_v8  ;;  %v1742_v6 = vpack.c.bf16 %v931_v5, %v930_v4 }
 0x625   :  { %1717 = vmatpush3.bf16.msra.mxu0 %v1714_v8  ;;  %v933_v8 = vld [vmem:[#allocation2 + $0x3d8] sm:$0xff] }
 0x6e3   :  { %v1396_v15 = vpop.f32.mrb[4].mxu0 }
 0x6e4   :  { %v624_v17 = vadd.f32 %v1396_v15, %v1063_v14  ;;  %v618_v18 = vpop.f32.mrb[5].mxu0 }
 0x6e5   :  { %v619_v19 = vadd.f32 %v1063_v14, %v618_v18 }
 0x6e6   :  { %v628_v16 = vadd.f32 %v624_v17, %v526_v13 }
 0x6e7   :  { %v627_v20 = vadd.f32 %v619_v19, %v525_v12  ;;  %v1718_v12 = vpack.c.bf16 %v789_v11, %v788_v10  ;;  %v1746_v10 = vpack.c.bf16 %v933_v8, %v932_v7  ;;  %v934_v11 = vld [vmem:[#allocation2 + $0x3e0] sm:$0xff] }
 0x6e8   :  { %635 = vadd.xlane.f32.xlu1 %v628_v16 }
 0x6e9   :  { %633 = vadd.xlane.f32.xlu0 %v627_v20  ;;  %1719 = vmatprep.subr.bf16.mxu0 %v1718_v12 }
 0x6ea   :  { %1721 = vmatpush3.bf16.msra.mxu0 %v1718_v12  ;;  %v935_v12 = vld [vmem:[#allocation2 + $0x3e8] sm:$0xff] }
 0x775   :  { %v636_v30 = vpop.xlane.xlu1 %635 }
 0x776   :  { %v638_v31 = vmul.f32 0.015625, %v636_v30  ;;  %v634_v32 = vpop.xlane.xlu0 %633  ;;  %v791_v30 = vld [vmem:[#allocation2 + $0x378] sm:$0xff] }
 0x777   :  { %v637_v33 = vmul.f32 0.015625, %v634_v32  ;;  %v1069_v32 = vld [vmem:[%s1938_s2 + $0x9] ss:$0 sm:$0xff] }
 0x778   :  { %v640_v34 = vsub.f32 %v628_v16, %v638_v31  ;;  %v1722_v31 = vpack.c.bf16 %v791_v30, %v790_v29 }
 0x779   :  { %v639_v35 = vsub.f32 %v627_v20, %v637_v33  ;;  %v1066_v20 = vld [vmem:[%s1938_s2 + $0xb] ss:$0 sm:$0xff] }
 0x77a   :  { %v1896_v36 = vmul.f32 %v1858_v9, %v640_v34  ;;  %1723 = vmatprep.subr.bf16.mxu0 %v1722_v31 }
 0x77b   :  { %v1899_v37 = vmul.f32 %v1858_v9, %v639_v35  ;;  %1725 = vmatpush3.bf16.msra.mxu0 %v1722_v31 }
 0x77c   :  { %v644_v38 = vmul.f32 %v1896_v36, %v1896_v36 }
 0x77d   :  { %v643_v39 = vmul.f32 %v1899_v37, %v1899_v37 }
 0x77e   :  { %647 = vadd.xlane.f32.xlu1 %v644_v38 }
 0x77f   :  { %645 = vadd.xlane.f32.xlu0 %v643_v39  ;;  %v1071_v39 = vld [vmem:[%s1938_s2 + $0xa] ss:$0 sm:$0xff] }
 0x80b   :  { %v648_v13 = vpop.xlane.xlu1 %647 }
 0x80c   :  { %v650_v14 = vmul.f32 0.015625, %v648_v13  ;;  %v646_v15 = vpop.xlane.xlu0 %645  ;;  %v936_v13 = vld [vmem:[#allocation2 + $0x3f0] sm:$0xff] }
 0x80d   :  { %v649_v17 = vmul.f32 0.015625, %v646_v15 }
 0x80e   :  { %v652_v18 = vadd.f32 1e-05, %v650_v14  ;;  %v937_v14 = vld [vmem:[#allocation2 + $0x3f8] sm:$0xff] }
 0x80f   :  { %v651_v19 = vadd.f32 1e-05, %v649_v17  ;;  %v1754_v15 = vpack.c.bf16 %v937_v14, %v936_v13 }
 0x810   :  { %1770 = vrsqrt.f32 %v652_v18 }
 0x811   :  { %1772 = vrsqrt.f32 %v651_v19 }
 0x81a   :  { %v1771_v16 = vpop.eup %1770 }
 0x81b   :  { %v1773_v21 = vpop.eup %1772  ;;  %v656_v22 = vmul.f32 %v1771_v16, %v1896_v36 }
 0x81c   :  { %v655_v23 = vmul.f32 %v1773_v21, %v1899_v37 }
 0x81d   :  { %v664_v25 = vmul.f32 %v1066_v20, %v656_v22 }
 0x81e   :  { %v663_v26 = vmul.f32 %v1066_v20, %v655_v23  ;;  %v1074_v23 = vld [vmem:[%s1938_s2 + $0xd] ss:$0 sm:$0xff] }
 0x81f   :  { %v672_v28 = vadd.f32 %v1067_v24, %v664_v25 }
 0x820   :  { %v671_v27 = vadd.f32 %v1067_v24, %v663_v26 }
 0x822   :  { %1429 = vmatprep.mubr.f32.mxu1 %v671_v27 }
 0x823   :  { %1430 = vmatmul.mubr.f32.vlgmr.msra.gmra.mrb[4].mxu1 %v672_v28 }
 0x824   :  { %1729 = vmatpush3.bf16.msra.mxu1 %v1726_v49 }
 0x825   :  { %1731 = vmatprep.subr.bf16.mxu1 %v1730_v51 }
 0x828   :  { %1733 = vmatpush3.bf16.msra.mxu1 %v1730_v51 }
 0x829   :  { %1735 = vmatprep.subr.bf16.mxu1 %v1734_v54 }
 0x82c   :  { %1737 = vmatpush3.bf16.msra.mxu1 %v1734_v54 }
 0x82d   :  { %1739 = vmatprep.subr.bf16.mxu1 %v1738_v3 }
 0x830   :  { %1741 = vmatpush3.bf16.msra.mxu1 %v1738_v3 }
 0x831   :  { %1743 = vmatprep.subr.bf16.mxu1 %v1742_v6 }
 0x834   :  { %1745 = vmatpush3.bf16.msra.mxu1 %v1742_v6 }
 0x835   :  { %1747 = vmatprep.subr.bf16.mxu1 %v1746_v10 }
 0x838   :  { %1749 = vmatpush3.bf16.msra.mxu1 %v1746_v10 }
 0x8f6   :  { %v1431_v33 = vpop.f32.mrb[4].mxu1 }
 0x8f7   :  { %v770_v34 = vadd.f32 %v1431_v33, %v1069_v32  ;;  %v764_v35 = vpop.f32.mrb[5].mxu1 }
 0x8f8   :  { %v765_v36 = vadd.f32 %v1069_v32, %v764_v35  ;;  %v1077_v32 = vld [vmem:[%s1938_s2 + $0xf] ss:$0 sm:$0xff] }
 0x8f9   :  { %v774_v38 = vmax.f32 %v770_v34, 0.0 }
 0x8fa   :  { %v773_v37 = vmax.f32 %v765_v36, 0.0 }
 0x8fc   :  { %1464 = vmatprep.mubr.f32.mxu0 %v773_v37 }
 0x8fd   :  { %1465 = vmatmul.mubr.f32.vlgmr.msra.gmra.mrb[6].mxu0 %v774_v38 }
 0x9d0   :  { %v1466_v40 = vpop.f32.mrb[6].mxu0 }
 0x9d1   :  { %v872_v41 = vadd.f32 %v1466_v40, %v1071_v39  ;;  %v866_v42 = vpop.f32.mrb[7].mxu0 }
 0x9d2   :  { %v867_v43 = vadd.f32 %v1071_v39, %v866_v42 }
 0x9d3   :  { %v876_v44 = vadd.f32 %v872_v41, %v672_v28 }
 0x9d4   :  { %v875_v45 = vadd.f32 %v867_v43, %v671_v27  ;;  %v1075_v27 = vld [vmem:[%s1938_s2 + $0xe] ss:$0 sm:$0xff] }
 0x9d5   :  { %883 = vadd.xlane.f32.xlu1 %v876_v44 }
 0x9d6   :  { %881 = vadd.xlane.f32.xlu0 %v875_v45 }
 0xa62   :  { %v884_v55 = vpop.xlane.xlu1 %883 }
 0xa63   :  { %v886_v56 = vmul.f32 0.015625, %v884_v55  ;;  %v882_v57 = vpop.xlane.xlu0 %881 }
 0xa64   :  { %v885_v58 = vmul.f32 0.015625, %v882_v57 }
 0xa65   :  { %v888_v59 = vsub.f32 %v876_v44, %v886_v56 }
 0xa66   :  { %v887_v60 = vsub.f32 %v875_v45, %v885_v58 }
 0xa67   :  { %v890_v61 = vmul.f32 %v1858_v9, %v888_v59 }
 0xa68   :  { %v889_v62 = vmul.f32 %v1858_v9, %v887_v60  ;;  %v1750_v9 = vpack.c.bf16 %v935_v12, %v934_v11 }
 0xa69   :  { %v892_v63 = vmul.f32 %v890_v61, %v890_v61 }
 0xa6a   :  { %v891_v0 = vmul.f32 %v889_v62, %v889_v62  ;;  %1751 = vmatprep.subr.bf16.mxu1 %v1750_v9 }
 0xa6b   :  { %895 = vadd.xlane.f32.xlu1 %v892_v63  ;;  %1753 = vmatpush3.bf16.msra.mxu1 %v1750_v9 }
 0xa6c   :  { %893 = vadd.xlane.f32.xlu0 %v891_v0  ;;  %1755 = vmatprep.subr.bf16.mxu1 %v1754_v15 }
 0xa6f   :  { %1757 = vmatpush3.bf16.msra.mxu1 %v1754_v15 }
 0xaf8   :  { %v896_v17 = vpop.xlane.xlu1 %895 }
 0xaf9   :  { %v898_v18 = vmul.f32 0.015625, %v896_v17  ;;  %v894_v19 = vpop.xlane.xlu0 %893 }
 0xafa   :  { %v897_v16 = vmul.f32 0.015625, %v894_v19 }
 0xafb   :  { %v900_v20 = vadd.f32 1e-05, %v898_v18 }
 0xafc   :  { %v899_v21 = vadd.f32 1e-05, %v897_v16 }
 0xafd   :  { %1774 = vrsqrt.f32 %v900_v20 }
 0xafe   :  { %1776 = vrsqrt.f32 %v899_v21 }
 0xb07   :  { %v1775_v22 = vpop.eup %1774 }
 0xb08   :  { %v1777_v24 = vpop.eup %1776  ;;  %v904_v25 = vmul.f32 %v1775_v22, %v890_v61 }
 0xb09   :  { %v903_v26 = vmul.f32 %v1777_v24, %v889_v62 }
 0xb0a   :  { %v912_v28 = vmul.f32 %v1074_v23, %v904_v25 }
 0xb0b   :  { %v911_v29 = vmul.f32 %v1074_v23, %v903_v26 }
 0xb0c   :  { %v920_v31 = vadd.f32 %v1075_v27, %v912_v28 }
 0xb0d   :  { %v919_v30 = vadd.f32 %v1075_v27, %v911_v29 }
 0xb0f   :  { %1499 = vmatprep.mubr.f32.mxu1 %v919_v30 }
 0xb10   :  { %1500 = vmatmul.mubr.f32.vlgmr.msra.gmra.mrb[6].mxu1 %v920_v31 }
 0xbe3   :  { %v1501_v33 = vpop.f32.mrb[6].mxu1 }
 0xbe4   :  { %v1018_v34 = vadd.f32 %v1501_v33, %v1077_v32  ;;  %v1012_v35 = vpop.f32.mrb[7].mxu1 }
 0xbe5   :  { %v1013_v36 = vadd.f32 %v1077_v32, %v1012_v35 }
 0xbe6   :  { %1023 = vmax.xlane.f32.xlu1 %v1018_v34 }
 0xbe7   :  { %1021 = vmax.xlane.f32.xlu0 %v1013_v36 }
 0xc73   :  { %v1024_v37 = vpop.xlane.xlu1 %1023 }
 0xc74   :  { %v1026_v38 = vsub.f32 %v1018_v34, %v1024_v37  ;;  %v1022_v39 = vpop.xlane.xlu0 %1021 }
 0xc75   :  { %v1025_v40 = vsub.f32 %v1013_v36, %v1022_v39 }
 0xc76   :  { %v1029_v41 = vmul.f32 1.442695, %v1026_v38 }
 0xc77   :  { %v1027_v42 = vmul.f32 1.442695, %v1025_v40 }
 0xc78   :  { %1778 = vpow2.f32 %v1029_v41 }
 0xc79   :  { %1780 = vpow2.f32 %v1027_v42 }
 0xc82   :  { %v1779_v43 = vpop.eup %1778 }
 0xc83   :  { %v1781_v44 = vpop.eup %1780  ;;  %1033 = vadd.xlane.f32.xlu1 %v1779_v43 }
 0xc84   :  { %1031 = vadd.xlane.f32.xlu0 %v1781_v44 }
 0xd10   :  { %v1034_v45 = vpop.xlane.xlu1 %1033 }
 0xd11   :  { %1782 = vrcp.f32 %v1034_v45  ;;  %v1032_v46 = vpop.xlane.xlu0 %1031 }
 0xd12   :  { %1784 = vrcp.f32 %v1032_v46 }
 0xd1b   :  { %v1783_v47 = vpop.eup %1782 }
 0xd1c   :  { %v1785_v48 = vpop.eup %1784  ;;  %v1038_v49 = vmul.f32 %v1783_v47, %v1779_v43 }
 0xd1d   :  { %v1036_v50 = vmul.f32 %v1785_v48, %v1781_v44 }
 0xd1e   :  { %1040 = vst [vmem:[%s1939_s3 + $0x8] sm:$0xff] %v1038_v49 }
 0xd1f   :  { %1039 = vst [vmem:[%s1939_s3] sm:$0xff] %v1036_v50 }
 0xd20   :  { %1045 = vsyncpa [#allocation3], 1 }

</bundles_post_ra>
